<compile_context>
chip_gen: v6e
topology: v6e:2x2x1
jax: 0.10.0
libtpu: 0.0.40
codegen_flags: <defaults>
</compile_context>

<pallas_src>
import jax
import jax.numpy as jnp
from jax.experimental import pallas as pl
from jax.experimental.pallas import tpu as pltpu


def _savg_tmax_fc_kernel(x_ref, w_ref, b_ref, o_ref):
    """x_ref: (TN, S, C, HW) native-layout block of TN clips.
    w_ref: (C, Kpad) transposed fc weight.  b_ref: (1, Kpad) f32.
    o_ref: (TN, Kpad) f32 logits."""
    _, num_segments, _, hw = x_ref.shape
    inv_hw = 1.0 / hw

    # AdaptiveAvgPool2d(1) + temporal max, streamed over segments: per segment
    # the spatial (lane-axis) sum is accumulated in f32 and folded into a
    # running (TN, C) max.  S is small and static, so a static Python loop is
    # the same code as fori_loop(unroll=True); the serial max dependence keeps
    # only one segment slab live at a time.
    def _pooled(s):
        seg = x_ref[:, s]                                           # (TN, C, HW)
        return jnp.sum(seg, axis=-1, dtype=jnp.float32) * inv_hw    # (TN, C)

    ft = _pooled(0)
    for s in range(1, num_segments):
        ft = jnp.maximum(ft, _pooled(s))

    # Dropout(p): identity in eval/inference mode.
    # TODO(synk): training-mode dropout (pltpu.prng_seed/prng_random_bits + 1/(1-p) scaling) not implemented.

    # fc on the MXU: keep the resident weight in its native dtype (no per-step
    # f32 re-materialization); cast ft down only for low-precision weights.
    w = w_ref[...]
    lhs = ft if w.dtype == jnp.float32 else ft.astype(w.dtype)
    logits = jnp.dot(lhs, w, preferred_element_type=jnp.float32)    # (TN, Kpad)
    o_ref[...] = (logits + b_ref[...]).astype(o_ref.dtype)


def _round_up(x, m):
    return ((x + m - 1) // m) * m


def _vmem_capacity_bytes(default_bytes=64 * 1024 * 1024):
    """Physical VMEM per core: 64 MiB on v7x, 128 MiB on v5e/v6e.  Falls back
    to the smallest (v7x-safe) figure if the query is unavailable."""
    try:
        cap = getattr(pltpu.get_tpu_info(), "vmem_capacity_bytes", None)
        if cap:
            return int(cap)
    except Exception:
        pass
    return default_bytes


def _padded_clip_vmem_bytes(s, c, hw, itemsize):
    """VMEM footprint of one clip's (S, C, HW) native-layout tile: HW is
    lane-padded to 128, C sublane-padded (8 f32 / 16 bf16 rows per vreg)."""
    sub = 8 * max(1, 4 // itemsize)
    return s * _round_up(c, sub) * _round_up(hw, 128) * itemsize


def _pick_block_n(n, s, c, hw, itemsize, x_budget_bytes):
    """Clips per grid step.  Fill the double-buffered x budget with the largest
    divisor of n (exact tiling -> no jnp.pad -> no extra HBM copy of x), then
    prefer an even step count so v7x's two TensorCores stay balanced."""
    per_clip = max(1, _padded_clip_vmem_bytes(s, c, hw, itemsize))
    cap = max(1, x_budget_bytes // (2 * per_clip))      # x block is double-buffered
    cap = min(cap, 256, n)
    block_n = 1
    for d in range(cap, 0, -1):                         # largest divisor of n <= cap
        if n % d == 0:
            block_n = d
            break
    g = n // block_n
    if g % 2 and g < n:
        # Look for a slightly smaller divisor (>= ~half the cap) giving an even
        # step count across the two v7x TensorCores.
        for d in range(block_n - 1, max(0, block_n // 2 - 1), -1):
            if n % d == 0 and (n // d) % 2 == 0:
                block_n, g = d, n // d
                break
    return block_n, g


def savg_drop_tmax_cls(input_tensor, w_t, bias, *, num_segments, num_features,
                       block_n=None):
    """input_tensor: (nt, chw) as in the PyTorch module.
    w_t:  (num_features, num_classes)  (transposed nn.Linear weight)
    bias: (num_classes,)
    Returns f32 logits of shape (n, num_classes)."""
    nt, chw = input_tensor.shape
    C = num_features
    S = num_segments
    hw = chw // C
    h = int(round(hw ** 0.5))
    assert h * h * C == chw, "chw must be num_features * h * h"
    assert nt % S == 0
    assert w_t.shape[0] == C
    n = nt // S
    K = w_t.shape[1]

    # Lane-dense classifier: pad num_classes up to a multiple of 128; pad and
    # cast the bias to f32 once here (not per grid step inside the kernel).
    k_pad = _round_up(K, 128)
    w_p = jnp.zeros((C, k_pad), w_t.dtype).at[:, :K].set(w_t)
    b_p = jnp.zeros((1, k_pad), jnp.float32).at[0, :K].set(bias.astype(jnp.float32))

    # Native layout: (nt, chw) -> (n, S, C, hw) is pure metadata on a
    # contiguous array -- each x element is read from HBM exactly once, by the
    # kernel's own block DMA.
    x = input_tensor.reshape(n, S, C, hw)

    itemsize = jnp.dtype(input_tensor.dtype).itemsize
    phys_vmem = _vmem_capacity_bytes()
    x_budget = max(16 * 1024 * 1024, phys_vmem // 2 - (8 << 20))
    per_clip_vmem = _padded_clip_vmem_bytes(S, C, hw, itemsize)

    if block_n is None:
        block_n, grid_n = _pick_block_n(n, S, C, hw, itemsize, x_budget)
    else:
        # Clamp a user-forced block so the double-buffered x block stays inside
        # physical VMEM (64 MiB on v7x even if it would fit a 128 MiB part).
        max_bn = max(1, (phys_vmem - (16 << 20)) // (2 * per_clip_vmem))
        block_n = max(1, int(min(block_n, n, max_bn)))
        grid_n = -(-n // block_n)

    n_pad = grid_n * block_n
    if n_pad != n:
        # Only reachable for a user-forced block_n: zero-pad tail clips (this
        # costs one extra HBM pass over x; the auto path uses exact tiling).
        x = jnp.pad(x, ((0, n_pad - n), (0, 0), (0, 0), (0, 0)))

    # Explicit VMEM ceiling (v5e's default scoped limit is only 16 MiB):
    # double-buffered x/out blocks + resident weights + f32 intermediates.
    w_itemsize = jnp.dtype(w_t.dtype).itemsize
    x_blk = block_n * per_clip_vmem
    w_blk = _round_up(C, 8 * max(1, 4 // w_itemsize)) * k_pad * w_itemsize
    b_blk = 8 * k_pad * 4
    out_blk = _round_up(block_n, 8) * k_pad * 4
    interm = 3 * _round_up(block_n, 8) * _round_up(C, 128) * 4 + out_blk
    vmem_limit = 2 * (x_blk + out_blk) + 2 * (w_blk + b_blk) + interm + (6 << 20)
    vmem_limit = int(min(max(vmem_limit, 32 * 1024 * 1024), phys_vmem - (2 << 20)))

    # Advisory cost: the op is HBM-read-bound (each x element read once).
    cost = pl.CostEstimate(
        flops=2 * n_pad * C * k_pad,
        transcendentals=0,
        bytes_accessed=int(n_pad * S * C * hw * itemsize
                           + (C + 1) * k_pad * w_itemsize
                           + n_pad * k_pad * 4),
    )

    def _build(weight_pipeline_mode):
        extra = ({} if weight_pipeline_mode is None
                 else {"pipeline_mode": weight_pipeline_mode})
        return pl.pallas_call(
            _savg_tmax_fc_kernel,
            out_shape=jax.ShapeDtypeStruct((grid_n, block_n, k_pad), jnp.float32),
            grid_spec=pltpu.PrefetchScalarGridSpec(
                num_scalar_prefetch=0,
                grid=(grid_n,),
                in_specs=[
                    # block_n clips per step, native (S, C, HW) layout; C/HW
                    # are full array dims so any block_n is (8,128)-legal.
                    pl.BlockSpec((block_n, S, C, hw), lambda i: (i, 0, 0, 0)),
                    # Constant index_map: resident across steps; request a
                    # single pipeline buffer (no re-DMA happens anyway).
                    pl.BlockSpec((C, k_pad), lambda i: (0, 0), **extra),
                    pl.BlockSpec((1, k_pad), lambda i: (0, 0), **extra),
                ],
                # Leading grid dim squeezed; (block_n, Kpad) equals the full
                # trailing array dims, so any block_n is layout-legal.
                out_specs=pl.BlockSpec((None, block_n, k_pad),
                                       lambda i: (i, 0, 0)),
            ),
            compiler_params=pltpu.CompilerParams(
                dimension_semantics=("parallel",),
                vmem_limit_bytes=vmem_limit,
            ),
            cost_estimate=cost,
        )

    try:
        out = _build(pl.Buffered(1))(x, w_p, b_p)
    except Exception:
        # Installed Pallas rejects single-buffered resident blocks: fall back
        # to the default double-buffered weight/bias (<= one extra block).
        out = _build(None)(x, w_p, b_p)

    return out.reshape(n_pad, k_pad)[:n, :K]


def _reference(input_tensor, w_t, bias, *, num_segments, num_features):
    nt, chw = input_tensor.shape
    hw = chw // num_features
    x = input_tensor.reshape(nt, num_features, hw).astype(jnp.float32)
    pooled = x.mean(axis=-1)                                    # (nt, C)
    pooled = pooled.reshape(-1, num_segments, num_features)     # (n, S, C)
    ft = pooled.max(axis=1)                                     # (n, C)
    return ft @ w_t.astype(jnp.float32) + bias.astype(jnp.float32)


if __name__ == "__main__":
    key = jax.random.PRNGKey(0)
    kx, kw, kb, kx2, kw2, kb2, kx3, kw3, kb3 = jax.random.split(key, 9)

    # Case 1: small shapes consistent with the module (f32, auto tiling).
    n, S, C, h, K = 2, 8, 32, 4, 10
    nt, chw = n * S, C * h * h
    x = jax.random.normal(kx, (nt, chw), dtype=jnp.float32)
    bound = 1.0 / (C ** 0.5)
    w = jax.random.uniform(kw, (K, C), minval=-bound, maxval=bound, dtype=jnp.float32)
    b = jax.random.uniform(kb, (K,), minval=-bound, maxval=bound, dtype=jnp.float32)
    w_t = w.T  # (C, K)

    out = jax.block_until_ready(
        savg_drop_tmax_cls(x, w_t, b, num_segments=S, num_features=C))
    ref = _reference(x, w_t, b, num_segments=S, num_features=C)
    assert out.shape == (n, K)
    assert jnp.allclose(out, ref, atol=1e-4, rtol=1e-4)

    # Case 2: multi-step grid + forced block_n exercising the tail-pad path.
    n2, S2, C2, h2, K2 = 3, 4, 16, 2, 5
    nt2, chw2 = n2 * S2, C2 * h2 * h2
    x2 = jax.random.normal(kx2, (nt2, chw2), dtype=jnp.float32)
    bound2 = 1.0 / (C2 ** 0.5)
    w2 = jax.random.uniform(kw2, (K2, C2), minval=-bound2, maxval=bound2,
                            dtype=jnp.float32)
    b2 = jax.random.uniform(kb2, (K2,), minval=-bound2, maxval=bound2,
                            dtype=jnp.float32)
    out2 = jax.block_until_ready(
        savg_drop_tmax_cls(x2, w2.T, b2, num_segments=S2, num_features=C2,
                           block_n=2))
    ref2 = _reference(x2, w2.T, b2, num_segments=S2, num_features=C2)
    assert out2.shape == (n2, K2)
    assert jnp.allclose(out2, ref2, atol=1e-4, rtol=1e-4)

    # Case 3: bf16 activations + bf16 classifier (half the HBM traffic; the
    # kernel accumulates in f32 and feeds the MXU bf16 operands directly).
    x3 = jax.random.normal(kx3, (nt, chw), dtype=jnp.float32).astype(jnp.bfloat16)
    w3 = jax.random.uniform(kw3, (K, C), minval=-bound, maxval=bound,
                            dtype=jnp.float32).astype(jnp.bfloat16)
    b3 = jax.random.uniform(kb3, (K,), minval=-bound, maxval=bound,
                            dtype=jnp.float32).astype(jnp.bfloat16)
    out3 = jax.block_until_ready(
        savg_drop_tmax_cls(x3, w3.T, b3, num_segments=S, num_features=C))
    ref3 = _reference(x3, w3.T, b3, num_segments=S, num_features=C)
    assert out3.shape == (n, K)
    assert jnp.allclose(out3, ref3, atol=3e-2, rtol=3e-2)

    print("KERNEL_OK")
</pallas_src>

<mosaic_0001>
module attributes {stable_mosaic.version = 11 : i64} {
  func.func @_savg_tmax_fc_kernel(%arg0: i32, %arg1: memref<1x8x32x16xf32, #tpu.memory_space<vmem>>, %arg2: memref<32x128xf32, #tpu.memory_space<vmem>>, %arg3: memref<1x128xf32, #tpu.memory_space<vmem>>, %arg4: memref<1x1x128xf32, #tpu.memory_space<vmem>>) attributes {dimension_semantics = [#tpu.dimension_semantics<parallel>], iteration_bounds = array<i64: 2>, scalar_prefetch = 0 : i64, scratch_operands = 0 : i64, tpu.core_type = #tpu.core_type<tc>, window_params = [{transform_indices = @transform_0, window_bounds = array<i64: 1, 8, 32, 16>}, {pipeline_mode = #tpu.pipeline_mode<synchronous>, transform_indices = @transform_1, window_bounds = array<i64: 32, 128>}, {pipeline_mode = #tpu.pipeline_mode<synchronous>, transform_indices = @transform_2, window_bounds = array<i64: 1, 128>}, {transform_indices = @transform_3, window_bounds = array<i64: 1, 1, 128>}]} {
    %c0 = arith.constant 0 : index
    %c0_0 = arith.constant 0 : index
    %c0_1 = arith.constant 0 : index
    %c0_2 = arith.constant 0 : index
    %0 = vector.load %arg1[%c0, %c0_0, %c0_1, %c0_2] : memref<1x8x32x16xf32, #tpu.memory_space<vmem>>, vector<1x1x32x16xf32>
    %1 = vector.shape_cast %0 : vector<1x1x32x16xf32> to vector<1x32x16xf32>
    %cst = arith.constant dense<0.000000e+00> : vector<1x32xf32>
    %2 = vector.multi_reduction <add>, %1, %cst [2] : vector<1x32x16xf32> to vector<1x32xf32>
    %cst_3 = arith.constant 6.250000e-02 : f32
    %3 = vector.broadcast %cst_3 : f32 to vector<1x32xf32>
    %4 = arith.mulf %2, %3 : vector<1x32xf32>
    %c0_4 = arith.constant 0 : index
    %c1 = arith.constant 1 : index
    %c0_5 = arith.constant 0 : index
    %c0_6 = arith.constant 0 : index
    %5 = vector.load %arg1[%c0_4, %c1, %c0_5, %c0_6] : memref<1x8x32x16xf32, #tpu.memory_space<vmem>>, vector<1x1x32x16xf32>
    %6 = vector.shape_cast %5 : vector<1x1x32x16xf32> to vector<1x32x16xf32>
    %cst_7 = arith.constant dense<0.000000e+00> : vector<1x32xf32>
    %7 = vector.multi_reduction <add>, %6, %cst_7 [2] : vector<1x32x16xf32> to vector<1x32xf32>
    %cst_8 = arith.constant 6.250000e-02 : f32
    %8 = vector.broadcast %cst_8 : f32 to vector<1x32xf32>
    %9 = arith.mulf %7, %8 : vector<1x32xf32>
    %10 = arith.maximumf %4, %9 : vector<1x32xf32>
    %c0_9 = arith.constant 0 : index
    %c2 = arith.constant 2 : index
    %c0_10 = arith.constant 0 : index
    %c0_11 = arith.constant 0 : index
    %11 = vector.load %arg1[%c0_9, %c2, %c0_10, %c0_11] : memref<1x8x32x16xf32, #tpu.memory_space<vmem>>, vector<1x1x32x16xf32>
    %12 = vector.shape_cast %11 : vector<1x1x32x16xf32> to vector<1x32x16xf32>
    %cst_12 = arith.constant dense<0.000000e+00> : vector<1x32xf32>
    %13 = vector.multi_reduction <add>, %12, %cst_12 [2] : vector<1x32x16xf32> to vector<1x32xf32>
    %cst_13 = arith.constant 6.250000e-02 : f32
    %14 = vector.broadcast %cst_13 : f32 to vector<1x32xf32>
    %15 = arith.mulf %13, %14 : vector<1x32xf32>
    %16 = arith.maximumf %10, %15 : vector<1x32xf32>
    %c0_14 = arith.constant 0 : index
    %c3 = arith.constant 3 : index
    %c0_15 = arith.constant 0 : index
    %c0_16 = arith.constant 0 : index
    %17 = vector.load %arg1[%c0_14, %c3, %c0_15, %c0_16] : memref<1x8x32x16xf32, #tpu.memory_space<vmem>>, vector<1x1x32x16xf32>
    %18 = vector.shape_cast %17 : vector<1x1x32x16xf32> to vector<1x32x16xf32>
    %cst_17 = arith.constant dense<0.000000e+00> : vector<1x32xf32>
    %19 = vector.multi_reduction <add>, %18, %cst_17 [2] : vector<1x32x16xf32> to vector<1x32xf32>
    %cst_18 = arith.constant 6.250000e-02 : f32
    %20 = vector.broadcast %cst_18 : f32 to vector<1x32xf32>
    %21 = arith.mulf %19, %20 : vector<1x32xf32>
    %22 = arith.maximumf %16, %21 : vector<1x32xf32>
    %c0_19 = arith.constant 0 : index
    %c4 = arith.constant 4 : index
    %c0_20 = arith.constant 0 : index
    %c0_21 = arith.constant 0 : index
    %23 = vector.load %arg1[%c0_19, %c4, %c0_20, %c0_21] : memref<1x8x32x16xf32, #tpu.memory_space<vmem>>, vector<1x1x32x16xf32>
    %24 = vector.shape_cast %23 : vector<1x1x32x16xf32> to vector<1x32x16xf32>
    %cst_22 = arith.constant dense<0.000000e+00> : vector<1x32xf32>
    %25 = vector.multi_reduction <add>, %24, %cst_22 [2] : vector<1x32x16xf32> to vector<1x32xf32>
    %cst_23 = arith.constant 6.250000e-02 : f32
    %26 = vector.broadcast %cst_23 : f32 to vector<1x32xf32>
    %27 = arith.mulf %25, %26 : vector<1x32xf32>
    %28 = arith.maximumf %22, %27 : vector<1x32xf32>
    %c0_24 = arith.constant 0 : index
    %c5 = arith.constant 5 : index
    %c0_25 = arith.constant 0 : index
    %c0_26 = arith.constant 0 : index
    %29 = vector.load %arg1[%c0_24, %c5, %c0_25, %c0_26] : memref<1x8x32x16xf32, #tpu.memory_space<vmem>>, vector<1x1x32x16xf32>
    %30 = vector.shape_cast %29 : vector<1x1x32x16xf32> to vector<1x32x16xf32>
    %cst_27 = arith.constant dense<0.000000e+00> : vector<1x32xf32>
    %31 = vector.multi_reduction <add>, %30, %cst_27 [2] : vector<1x32x16xf32> to vector<1x32xf32>
    %cst_28 = arith.constant 6.250000e-02 : f32
    %32 = vector.broadcast %cst_28 : f32 to vector<1x32xf32>
    %33 = arith.mulf %31, %32 : vector<1x32xf32>
    %34 = arith.maximumf %28, %33 : vector<1x32xf32>
    %c0_29 = arith.constant 0 : index
    %c6 = arith.constant 6 : index
    %c0_30 = arith.constant 0 : index
    %c0_31 = arith.constant 0 : index
    %35 = vector.load %arg1[%c0_29, %c6, %c0_30, %c0_31] : memref<1x8x32x16xf32, #tpu.memory_space<vmem>>, vector<1x1x32x16xf32>
    %36 = vector.shape_cast %35 : vector<1x1x32x16xf32> to vector<1x32x16xf32>
    %cst_32 = arith.constant dense<0.000000e+00> : vector<1x32xf32>
    %37 = vector.multi_reduction <add>, %36, %cst_32 [2] : vector<1x32x16xf32> to vector<1x32xf32>
    %cst_33 = arith.constant 6.250000e-02 : f32
    %38 = vector.broadcast %cst_33 : f32 to vector<1x32xf32>
    %39 = arith.mulf %37, %38 : vector<1x32xf32>
    %40 = arith.maximumf %34, %39 : vector<1x32xf32>
    %c0_34 = arith.constant 0 : index
    %c7 = arith.constant 7 : index
    %c0_35 = arith.constant 0 : index
    %c0_36 = arith.constant 0 : index
    %41 = vector.load %arg1[%c0_34, %c7, %c0_35, %c0_36] : memref<1x8x32x16xf32, #tpu.memory_space<vmem>>, vector<1x1x32x16xf32>
    %42 = vector.shape_cast %41 : vector<1x1x32x16xf32> to vector<1x32x16xf32>
    %cst_37 = arith.constant dense<0.000000e+00> : vector<1x32xf32>
    %43 = vector.multi_reduction <add>, %42, %cst_37 [2] : vector<1x32x16xf32> to vector<1x32xf32>
    %cst_38 = arith.constant 6.250000e-02 : f32
    %44 = vector.broadcast %cst_38 : f32 to vector<1x32xf32>
    %45 = arith.mulf %43, %44 : vector<1x32xf32>
    %46 = arith.maximumf %40, %45 : vector<1x32xf32>
    %c0_39 = arith.constant 0 : index
    %c0_40 = arith.constant 0 : index
    %47 = vector.load %arg2[%c0_39, %c0_40] : memref<32x128xf32, #tpu.memory_space<vmem>>, vector<32x128xf32>
    %cst_41 = arith.constant dense<0.000000e+00> : vector<1x128xf32>
    %48 = tpu.matmul %46, %47, %cst_41 {dimension_numbers = #tpu.dot_dimension_numbers<[1], [0], [0], [1], [0, 0, 1, 1], [], []>} : vector<1x32xf32>, vector<32x128xf32>, vector<1x128xf32> -> vector<1x128xf32>
    %c0_42 = arith.constant 0 : index
    %c0_43 = arith.constant 0 : index
    %49 = vector.load %arg3[%c0_42, %c0_43] : memref<1x128xf32, #tpu.memory_space<vmem>>, vector<1x128xf32>
    %50 = arith.addf %48, %49 : vector<1x128xf32>
    %c0_44 = arith.constant 0 : index
    %c0_45 = arith.constant 0 : index
    %c0_46 = arith.constant 0 : index
    %51 = vector.load %arg4[%c0_44, %c0_45, %c0_46] : memref<1x1x128xf32, #tpu.memory_space<vmem>>, vector<1x1x128xf32>
    %52 = vector.shape_cast %51 : vector<1x1x128xf32> to vector<1x128xf32>
    %53 = vector.shape_cast %50 : vector<1x128xf32> to vector<1x1x128xf32>
    tpu.vector_store %arg4[%c0_44, %c0_45, %c0_46], %53 {strides = array<i32>} : memref<1x1x128xf32, #tpu.memory_space<vmem>>, vector<1x1x128xf32>,
    return
  }
  func.func @transform_0(%arg0: i32) -> (i32, i32, i32, i32) {
    %c0_i32 = arith.constant 0 : i32
    %c0_i32_0 = arith.constant 0 : i32
    %c0_i32_1 = arith.constant 0 : i32
    %c0_i32_2 = arith.constant 0 : i32
    return %arg0, %c0_i32, %c0_i32_0, %c0_i32_1 : i32, i32, i32, i32
  }
  func.func @transform_1(%arg0: i32) -> (i32, i32) {
    %c0_i32 = arith.constant 0 : i32
    %c0_i32_0 = arith.constant 0 : i32
    %c0_i32_1 = arith.constant 0 : i32
    return %c0_i32, %c0_i32_0 : i32, i32
  }
  func.func @transform_2(%arg0: i32) -> (i32, i32) {
    %c0_i32 = arith.constant 0 : i32
    %c0_i32_0 = arith.constant 0 : i32
    %c0_i32_1 = arith.constant 0 : i32
    return %c0_i32, %c0_i32_0 : i32, i32
  }
  func.func @transform_3(%arg0: i32) -> (i32, i32, i32) {
    %c0_i32 = arith.constant 0 : i32
    %c0_i32_0 = arith.constant 0 : i32
    %c0_i32_1 = arith.constant 0 : i32
    return %arg0, %c0_i32, %c0_i32_0 : i32, i32, i32
  }
}

module attributes {stable_mosaic.version = 11 : i64} {
  func.func @_savg_tmax_fc_kernel(%arg0: i32, %arg1: memref<1x8x32x16xf32, #tpu.memory_space<vmem>>, %arg2: memref<32x128xf32, #tpu.memory_space<vmem>>, %arg3: memref<1x128xf32, #tpu.memory_space<vmem>>, %arg4: memref<1x1x128xf32, #tpu.memory_space<vmem>>) attributes {dimension_semantics = [#tpu.dimension_semantics<parallel>], iteration_bounds = array<i64: 2>, scalar_prefetch = 0 : i64, scratch_operands = 0 : i64, tpu.core_type = #tpu.core_type<tc>, window_params = [{transform_indices = @transform_0, window_bounds = array<i64: 1, 8, 32, 16>}, {pipeline_mode = #tpu.pipeline_mode<synchronous>, transform_indices = @transform_1, window_bounds = array<i64: 32, 128>}, {pipeline_mode = #tpu.pipeline_mode<synchronous>, transform_indices = @transform_2, window_bounds = array<i64: 1, 128>}, {transform_indices = @transform_3, window_bounds = array<i64: 1, 1, 128>}]} {
    %c0 = arith.constant 0 : index
    %c0_0 = arith.constant 0 : index
    %c0_1 = arith.constant 0 : index
    %c0_2 = arith.constant 0 : index
    %0 = vector.load %arg1[%c0, %c0_0, %c0_1, %c0_2] : memref<1x8x32x16xf32, #tpu.memory_space<vmem>>, vector<1x1x32x16xf32>
    %1 = vector.shape_cast %0 : vector<1x1x32x16xf32> to vector<1x32x16xf32>
    %cst = arith.constant dense<0.000000e+00> : vector<1x32xf32>
    %2 = vector.multi_reduction <add>, %1, %cst [2] : vector<1x32x16xf32> to vector<1x32xf32>
    %cst_3 = arith.constant 6.250000e-02 : f32
    %3 = vector.broadcast %cst_3 : f32 to vector<1x32xf32>
    %4 = arith.mulf %2, %3 : vector<1x32xf32>
    %c0_4 = arith.constant 0 : index
    %c1 = arith.constant 1 : index
    %c0_5 = arith.constant 0 : index
    %c0_6 = arith.constant 0 : index
    %5 = vector.load %arg1[%c0_4, %c1, %c0_5, %c0_6] : memref<1x8x32x16xf32, #tpu.memory_space<vmem>>, vector<1x1x32x16xf32>
    %6 = vector.shape_cast %5 : vector<1x1x32x16xf32> to vector<1x32x16xf32>
    %cst_7 = arith.constant dense<0.000000e+00> : vector<1x32xf32>
    %7 = vector.multi_reduction <add>, %6, %cst_7 [2] : vector<1x32x16xf32> to vector<1x32xf32>
    %cst_8 = arith.constant 6.250000e-02 : f32
    %8 = vector.broadcast %cst_8 : f32 to vector<1x32xf32>
    %9 = arith.mulf %7, %8 : vector<1x32xf32>
    %10 = arith.maximumf %4, %9 : vector<1x32xf32>
    %c0_9 = arith.constant 0 : index
    %c2 = arith.constant 2 : index
    %c0_10 = arith.constant 0 : index
    %c0_11 = arith.constant 0 : index
    %11 = vector.load %arg1[%c0_9, %c2, %c0_10, %c0_11] : memref<1x8x32x16xf32, #tpu.memory_space<vmem>>, vector<1x1x32x16xf32>
    %12 = vector.shape_cast %11 : vector<1x1x32x16xf32> to vector<1x32x16xf32>
    %cst_12 = arith.constant dense<0.000000e+00> : vector<1x32xf32>
    %13 = vector.multi_reduction <add>, %12, %cst_12 [2] : vector<1x32x16xf32> to vector<1x32xf32>
    %cst_13 = arith.constant 6.250000e-02 : f32
    %14 = vector.broadcast %cst_13 : f32 to vector<1x32xf32>
    %15 = arith.mulf %13, %14 : vector<1x32xf32>
    %16 = arith.maximumf %10, %15 : vector<1x32xf32>
    %c0_14 = arith.constant 0 : index
    %c3 = arith.constant 3 : index
    %c0_15 = arith.constant 0 : index
    %c0_16 = arith.constant 0 : index
    %17 = vector.load %arg1[%c0_14, %c3, %c0_15, %c0_16] : memref<1x8x32x16xf32, #tpu.memory_space<vmem>>, vector<1x1x32x16xf32>
    %18 = vector.shape_cast %17 : vector<1x1x32x16xf32> to vector<1x32x16xf32>
    %cst_17 = arith.constant dense<0.000000e+00> : vector<1x32xf32>
    %19 = vector.multi_reduction <add>, %18, %cst_17 [2] : vector<1x32x16xf32> to vector<1x32xf32>
    %cst_18 = arith.constant 6.250000e-02 : f32
    %20 = vector.broadcast %cst_18 : f32 to vector<1x32xf32>
    %21 = arith.mulf %19, %20 : vector<1x32xf32>
    %22 = arith.maximumf %16, %21 : vector<1x32xf32>
    %c0_19 = arith.constant 0 : index
    %c4 = arith.constant 4 : index
    %c0_20 = arith.constant 0 : index
    %c0_21 = arith.constant 0 : index
    %23 = vector.load %arg1[%c0_19, %c4, %c0_20, %c0_21] : memref<1x8x32x16xf32, #tpu.memory_space<vmem>>, vector<1x1x32x16xf32>
    %24 = vector.shape_cast %23 : vector<1x1x32x16xf32> to vector<1x32x16xf32>
    %cst_22 = arith.constant dense<0.000000e+00> : vector<1x32xf32>
    %25 = vector.multi_reduction <add>, %24, %cst_22 [2] : vector<1x32x16xf32> to vector<1x32xf32>
    %cst_23 = arith.constant 6.250000e-02 : f32
    %26 = vector.broadcast %cst_23 : f32 to vector<1x32xf32>
    %27 = arith.mulf %25, %26 : vector<1x32xf32>
    %28 = arith.maximumf %22, %27 : vector<1x32xf32>
    %c0_24 = arith.constant 0 : index
    %c5 = arith.constant 5 : index
    %c0_25 = arith.constant 0 : index
    %c0_26 = arith.constant 0 : index
    %29 = vector.load %arg1[%c0_24, %c5, %c0_25, %c0_26] : memref<1x8x32x16xf32, #tpu.memory_space<vmem>>, vector<1x1x32x16xf32>
    %30 = vector.shape_cast %29 : vector<1x1x32x16xf32> to vector<1x32x16xf32>
    %cst_27 = arith.constant dense<0.000000e+00> : vector<1x32xf32>
    %31 = vector.multi_reduction <add>, %30, %cst_27 [2] : vector<1x32x16xf32> to vector<1x32xf32>
    %cst_28 = arith.constant 6.250000e-02 : f32
    %32 = vector.broadcast %cst_28 : f32 to vector<1x32xf32>
    %33 = arith.mulf %31, %32 : vector<1x32xf32>
    %34 = arith.maximumf %28, %33 : vector<1x32xf32>
    %c0_29 = arith.constant 0 : index
    %c6 = arith.constant 6 : index
    %c0_30 = arith.constant 0 : index
    %c0_31 = arith.constant 0 : index
    %35 = vector.load %arg1[%c0_29, %c6, %c0_30, %c0_31] : memref<1x8x32x16xf32, #tpu.memory_space<vmem>>, vector<1x1x32x16xf32>
    %36 = vector.shape_cast %35 : vector<1x1x32x16xf32> to vector<1x32x16xf32>
    %cst_32 = arith.constant dense<0.000000e+00> : vector<1x32xf32>
    %37 = vector.multi_reduction <add>, %36, %cst_32 [2] : vector<1x32x16xf32> to vector<1x32xf32>
    %cst_33 = arith.constant 6.250000e-02 : f32
    %38 = vector.broadcast %cst_33 : f32 to vector<1x32xf32>
    %39 = arith.mulf %37, %38 : vector<1x32xf32>
    %40 = arith.maximumf %34, %39 : vector<1x32xf32>
    %c0_34 = arith.constant 0 : index
    %c7 = arith.constant 7 : index
    %c0_35 = arith.constant 0 : index
    %c0_36 = arith.constant 0 : index
    %41 = vector.load %arg1[%c0_34, %c7, %c0_35, %c0_36] : memref<1x8x32x16xf32, #tpu.memory_space<vmem>>, vector<1x1x32x16xf32>
    %42 = vector.shape_cast %41 : vector<1x1x32x16xf32> to vector<1x32x16xf32>
    %cst_37 = arith.constant dense<0.000000e+00> : vector<1x32xf32>
    %43 = vector.multi_reduction <add>, %42, %cst_37 [2] : vector<1x32x16xf32> to vector<1x32xf32>
    %cst_38 = arith.constant 6.250000e-02 : f32
    %44 = vector.broadcast %cst_38 : f32 to vector<1x32xf32>
    %45 = arith.mulf %43, %44 : vector<1x32xf32>
    %46 = arith.maximumf %40, %45 : vector<1x32xf32>
    %c0_39 = arith.constant 0 : index
    %c0_40 = arith.constant 0 : index
    %47 = vector.load %arg2[%c0_39, %c0_40] : memref<32x128xf32, #tpu.memory_space<vmem>>, vector<32x128xf32>
    %cst_41 = arith.constant dense<0.000000e+00> : vector<1x128xf32>
    %48 = tpu.matmul %46, %47, %cst_41 {dimension_numbers = #tpu.dot_dimension_numbers<[1], [0], [0], [1], [0, 0, 1, 1], [], []>} : vector<1x32xf32>, vector<32x128xf32>, vector<1x128xf32> -> vector<1x128xf32>
    %c0_42 = arith.constant 0 : index
    %c0_43 = arith.constant 0 : index
    %49 = vector.load %arg3[%c0_42, %c0_43] : memref<1x128xf32, #tpu.memory_space<vmem>>, vector<1x128xf32>
    %50 = arith.addf %48, %49 : vector<1x128xf32>
    %c0_44 = arith.constant 0 : index
    %c0_45 = arith.constant 0 : index
    %c0_46 = arith.constant 0 : index
    %51 = vector.load %arg4[%c0_44, %c0_45, %c0_46] : memref<1x1x128xf32, #tpu.memory_space<vmem>>, vector<1x1x128xf32>
    %52 = vector.shape_cast %51 : vector<1x1x128xf32> to vector<1x128xf32>
    %53 = vector.shape_cast %50 : vector<1x128xf32> to vector<1x1x128xf32>
    tpu.vector_store %arg4[%c0_44, %c0_45, %c0_46], %53 {strides = array<i32>} : memref<1x1x128xf32, #tpu.memory_space<vmem>>, vector<1x1x128xf32>,
    return
  }
  func.func @transform_0(%arg0: i32) -> (i32, i32, i32, i32) {
    %c0_i32 = arith.constant 0 : i32
    %c0_i32_0 = arith.constant 0 : i32
    %c0_i32_1 = arith.constant 0 : i32
    %c0_i32_2 = arith.constant 0 : i32
    return %arg0, %c0_i32, %c0_i32_0, %c0_i32_1 : i32, i32, i32, i32
  }
  func.func @transform_1(%arg0: i32) -> (i32, i32) {
    %c0_i32 = arith.constant 0 : i32
    %c0_i32_0 = arith.constant 0 : i32
    %c0_i32_1 = arith.constant 0 : i32
    return %c0_i32, %c0_i32_0 : i32, i32
  }
  func.func @transform_2(%arg0: i32) -> (i32, i32) {
    %c0_i32 = arith.constant 0 : i32
    %c0_i32_0 = arith.constant 0 : i32
    %c0_i32_1 = arith.constant 0 : i32
    return %c0_i32, %c0_i32_0 : i32, i32
  }
  func.func @transform_3(%arg0: i32) -> (i32, i32, i32) {
    %c0_i32 = arith.constant 0 : i32
    %c0_i32_0 = arith.constant 0 : i32
    %c0_i32_1 = arith.constant 0 : i32
    return %arg0, %c0_i32, %c0_i32_0 : i32, i32, i32
  }
}

</mosaic_0001>

<bundles_post_ra>
// kernel: tpu_custom_call.1
= control target key start
LH: loop header
LB: loop body
LE: loop exit
PB: predicated region body
PF: predicated region fallthrough
CT: control target
= control target key end

     0   :  { %8 = vsyncpa [#allocation3], 0  ;;  %s897_s0 = inlined_call_operand.vmem [shape: f32[2,8,32,16], index: 0, kind: input, shape index: {}]   ;;  %s898_s1 = inlined_call_operand.vmem [shape: f32[32,128], index: 1, kind: input, shape index: {}]   ;;  %s899_s2 = inlined_call_operand.vmem [shape: f32[1,128], index: 2, kind: input, shape index: {}]   ;;  %s900_s3 = inlined_call_operand.hbm [shape: f32[2,1,128], index: 3, kind: output, shape index: {}]  }
   0x1   :  { %10 = vsyncpa [#allocation3 + $0x1], 0  ;;  %s723_s12 = smov 0   ;;  %s725_s13 = smov 0  }
   0x2   :  { %s727_s14 = smov 0   ;;  %s729_s15 = smov 0  }
   0x3 LB: > { %s744_s16 = sadd.s32 4294967295, %s698_s15   ;;  %s542_s17 = sadd.s32 4294967294, %s698_s15   ;;  %s698_s15 = sphi %s729_s15, %s906_s15   ;;  %s694_s14 = sphi %s727_s14, %s905_s14   ;;  %s690_s13 = sphi %s725_s13, %s904_s13   ;;  %s686_s12 = sphi %s723_s12, %s903_s12  }
   0x4   : > { %s748_s18 = sadd.s32 1, %s698_s15   ;;  %s91_s19 = sadd.s32 1, %s694_s14 }
   0x5   : > { %s88_s20 = ssub.s32 %s698_s15, %s748_s18  ;;  %p101_p0 = scmp.ne.s32.totalorder %s694_s14, %s690_s13 }
   0x6   : > { %p89_p1 = scmp.eq.s32.totalorder %s88_s20, 0  ;;  %p102_p2 = scmp.eq.s32.totalorder %s744_s16, 1 }
   0x7   : > { %p107_p3 = scmp.ne.s32.totalorder %s690_s13, %s686_s12  ;;  %p108_p4 = scmp.eq.s32.totalorder %s542_s17, 1 }
   0x8   : > { %s759_s21 = scalar_select %p89_p1, %s694_s14, %s91_s19  }
   0x9   : > { %p761_p5 = por %p102_p2, %p101_p0  ;;  %p765_p6 = por %p108_p4, %p107_p3 }
   0xa   : > { %p545_p7 = scmp.ge.s32.totalorder %s698_s15, 1  ;;  %p140_p8 = scmp.lt.s32.totalorder %s698_s15, 3 }
   0xc   : > { %p141_p9 = pnand %p545_p7, %p140_p8 }
   0xd   : > { %p163_p10 = scmp.lt.s32.totalorder (!%p141_p9), %s744_s16, 1  ;;  %s161_s10 = sand.u32 (!%p141_p9), 1, %s690_s13  }
   0xe   : > { %144 = sbr.rel (%p141_p9) target bundleno = 440 (0x1b8), region = 32  ;;  %s577_s19 = sshll.u32 (!%p141_p9), %s744_s16, 4 }
   0xf   : > { %s162_s20 = scalar_lea.vmem (!%p141_p9), [#allocation2], %s161_s10  ;;  %s862_s27 = scalar_lea.hbm (!%p141_p9), %s900_s3, %s577_s19 }
  0x10   : > { %s702_s30 = smov (!%p141_p9), [#allocation2]  }
  0x13   : > { %s164_s24 = scalar_select %p163_p10, %s744_s16, 1  ;;  %vm172_vm0 = vcmask 130048   ;;  %vm701_vm1 = vmmov 0   ;;  %vm384_vm2 = vcmask 130112   ;;  %vm391_vm3 = vcmask 195712  }
  0x14   : > { %vm398_vm4 = vcmask 261312   ;;  %vm400_vm5 = vcmask 261120   ;;  %s642_s16 = sshll.u32 %s702_s30, 4  ;;  %s643_s16 = int_to_ptr.vmem [resolvable:$false] %s642_s16 }
  0x15   : > { %s580_s25 = sshll.u32 %s164_s24, 8  ;;  %s487_s24 = sshll.u32 %s162_s20, 4  ;;  %s488_s24 = int_to_ptr.vmem [resolvable:$true] %s487_s24 }
  0x16   : > { %s776_s28 = scalar_lea.vmem %s897_s0, %s580_s25  ;;  %s638_s29 = scalar_lea.vmem %s488_s24, 16 }
  0x17   : > { %v548_v0 = vld [vmem:[%s776_s28 + $0x20] sm:$0xff]  ;;  %v549_v2 = vld [vmem:[%s776_s28 + $0x28] sm:$0xff]  ;;  %v550_v8 = vld [vmem:[%s776_s28 + $0x30] sm:$0xff]  ;;  %p639_p11 = scmp.ne.s32.totalorder %s488_s24, %s638_s29  ;;  %s644_s4 = scalar_lea.vmem %s643_s16, 32 }
  0x18   : > { %v168_v1 = vld [vmem:[%s776_s28] sm:$0xff]  ;;  %v194_v3 = vsel %vm172_vm0, %v548_v0, 0.0  ;;  %v169_v5 = vld [vmem:[%s776_s28 + $0x8] sm:$0xff]  ;;  %v197_v6 = vsel %vm172_vm0, %v549_v2, 0.0  ;;  %v170_v9 = vld [vmem:[%s776_s28 + $0x10] sm:$0xff]  ;;  %v200_v10 = vsel %vm172_vm0, %v550_v8, 0.0  ;;  %p645_p0 = scmp.lt.s32.totalorder %s488_s24, %s643_s16  ;;  %p646_p1 = scmp.lt.s32.totalorder %s644_s4, %s638_s29 }
  0x19   : > { %v173_v4 = vsel %vm172_vm0, %v168_v1, 0.0  ;;  %195 = vadd.xlane.f32.xlu1 %v194_v3  ;;  %v176_v7 = vsel %vm172_vm0, %v169_v5, 0.0  ;;  %v179_v11 = vsel %vm172_vm0, %v170_v9, 0.0  ;;  %v551_v12 = vld [vmem:[%s776_s28 + $0x38] sm:$0xff]  ;;  %v553_v16 = vld [vmem:[%s776_s28 + $0x48] sm:$0xff]  ;;  %v552_v17 = vld [vmem:[%s776_s28 + $0x40] sm:$0xff]  ;;  %p640_p12 = pnand %p639_p11, %p761_p5 }
  0x1a   : > { %174 = vadd.xlane.f32.xlu0 %v173_v4  ;;  %v171_v13 = vld [vmem:[%s776_s28 + $0x18] sm:$0xff]  ;;  %v203_v14 = vsel %vm172_vm0, %v551_v12, 0.0  ;;  %v222_v18 = vsel %vm172_vm0, %v553_v16, 0.0  ;;  %v219_v19 = vsel %vm172_vm0, %v552_v17, 0.0  ;;  %v554_v21 = vld [vmem:[%s776_s28 + $0x50] sm:$0xff]  ;;  %v557_v24 = vld [vmem:[%s776_s28 + $0x68] sm:$0xff]  ;;  %p647_p2 = por %p646_p1, %p645_p0 }
  0x1b   : > { %v182_v15 = vsel %vm172_vm0, %v171_v13, 0.0  ;;  %v555_v20 = vld [vmem:[%s776_s28 + $0x58] sm:$0xff]  ;;  %v225_v23 = vsel %vm172_vm0, %v554_v21, 0.0  ;;  %v556_v25 = vld [vmem:[%s776_s28 + $0x60] sm:$0xff]  ;;  %v247_v26 = vsel %vm172_vm0, %v557_v24, 0.0  ;;  %v558_v29 = vld [vmem:[%s776_s28 + $0x70] sm:$0xff]  ;;  %p641_p13 = pneg %p640_p12 }
  0x1c   : > { %v228_v22 = vsel %vm172_vm0, %v555_v20, 0.0  ;;  %v244_v27 = vsel %vm172_vm0, %v556_v25, 0.0  ;;  %v559_v28 = vld [vmem:[%s776_s28 + $0x78] sm:$0xff]  ;;  %v250_v31 = vsel %vm172_vm0, %v558_v29, 0.0  ;;  %v561_v32 = vld [vmem:[%s776_s28 + $0x88] sm:$0xff]  ;;  %v560_v33 = vld [vmem:[%s776_s28 + $0x80] sm:$0xff] }
  0x1d   : > { %198 = vadd.xlane.f32.xlu1 %v197_v6  ;;  %v253_v30 = vsel %vm172_vm0, %v559_v28, 0.0  ;;  %v272_v34 = vsel %vm172_vm0, %v561_v32, 0.0  ;;  %v269_v35 = vsel %vm172_vm0, %v560_v33, 0.0  ;;  %v563_v36 = vld [vmem:[%s776_s28 + $0x98] sm:$0xff]  ;;  %v562_v37 = vld [vmem:[%s776_s28 + $0x90] sm:$0xff]  ;;  %v565_v40 = vld [vmem:[%s776_s28 + $0xa8] sm:$0xff]  ;;  %v373_v33 = vlaneseq  ;;  %p648_p3 = pnand %p647_p2, %p641_p13 }
  0x1e   : > { %177 = vadd.xlane.f32.xlu0 %v176_v7  ;;  %v278_v38 = vsel %vm172_vm0, %v563_v36, 0.0  ;;  %v275_v39 = vsel %vm172_vm0, %v562_v37, 0.0  ;;  %v564_v41 = vld [vmem:[%s776_s28 + $0xa0] sm:$0xff]  ;;  %v297_v42 = vsel %vm172_vm0, %v565_v40, 0.0  ;;  %v567_v44 = vld [vmem:[%s776_s28 + $0xb8] sm:$0xff]  ;;  %v566_v45 = vld [vmem:[%s776_s28 + $0xb0] sm:$0xff] }
  0x1f   : > { %v294_v43 = vsel %vm172_vm0, %v564_v41, 0.0  ;;  %v303_v46 = vsel %vm172_vm0, %v567_v44, 0.0  ;;  %v300_v47 = vsel %vm172_vm0, %v566_v45, 0.0  ;;  %v569_v48 = vld [vmem:[%s776_s28 + $0xc8] sm:$0xff]  ;;  %v568_v49 = vld [vmem:[%s776_s28 + $0xc0] sm:$0xff]  ;;  %v571_v52 = vld [vmem:[%s776_s28 + $0xd8] sm:$0xff] }
  0x20   : > { %v322_v50 = vsel %vm172_vm0, %v569_v48, 0.0  ;;  %v319_v51 = vsel %vm172_vm0, %v568_v49, 0.0  ;;  %v570_v53 = vld [vmem:[%s776_s28 + $0xd0] sm:$0xff]  ;;  %v328_v54 = vsel %vm172_vm0, %v571_v52, 0.0  ;;  %v573_v56 = vld [vmem:[%s776_s28 + $0xe8] sm:$0xff]  ;;  %v572_v57 = vld [vmem:[%s776_s28 + $0xe0] sm:$0xff] }
  0x21   : > { %201 = vadd.xlane.f32.xlu1 %v200_v10  ;;  %v325_v55 = vsel %vm172_vm0, %v570_v53, 0.0  ;;  %v347_v58 = vsel %vm172_vm0, %v573_v56, 0.0  ;;  %v344_v59 = vsel %vm172_vm0, %v572_v57, 0.0  ;;  %v575_v60 = vld [vmem:[%s776_s28 + $0xf8] sm:$0xff]  ;;  %v574_v61 = vld [vmem:[%s776_s28 + $0xf0] sm:$0xff]  ;;  %v700_v0 = vmov 0.0  }
  0x22   : > { %180 = vadd.xlane.f32.xlu0 %v179_v11  ;;  %v353_v62 = vsel %vm172_vm0, %v575_v60, 0.0  ;;  %v350_v63 = vsel %vm172_vm0, %v574_v61, 0.0  ;;  %586 = vmatprep.subr.mxu0 %v700_v0  ;;  %v367_v1 = vld [vmem:[%s898_s1 + $0x18] sm:$0xff]  ;;  %v366_v2 = vld [vmem:[%s898_s1 + $0x10] sm:$0xff]  ;;  %v365_v3 = vld [vmem:[%s898_s1 + $0x8] sm:$0xff]  ;;  %v374_v52 = vand.u32 127, %v373_v33 }
  0x23   : > { %587 = vmatpush3.msra.mxu0 %v367_v1  ;;  %v364_v4 = vld [vmem:[%s898_s1] sm:$0xff]  ;;  %594 = vmatprep.mubr.msk.f32.mxu0 %vm701_vm1, %v700_v0  ;;  %s475_s28 = scalar_lea.sflag [#allocation3], %s161_s10 }
  0x24   : > { %588 = vmatprep.subr.mxu0 %v700_v0 }
  0x25   : > { %204 = vadd.xlane.f32.xlu1 %v203_v14  ;;  %589 = vmatpush3.msra.mxu0 %v366_v2 }
  0x26   : > { %183 = vadd.xlane.f32.xlu0 %v182_v15  ;;  %590 = vmatprep.subr.mxu0 %v700_v0 }
  0x27   : > { %591 = vmatpush3.msra.mxu0 %v365_v3 }
  0x28   : > { %592 = vmatprep.subr.mxu0 %v700_v0 }
  0x29   : > { %223 = vadd.xlane.f32.xlu1 %v222_v18  ;;  %593 = vmatpush3.msra.mxu0 %v364_v4 }
  0x2a   : > { %220 = vadd.xlane.f32.xlu0 %v219_v19 }
  0x2d   : > { %229 = vadd.xlane.f32.xlu1 %v228_v22 }
  0x2e   : > { %226 = vadd.xlane.f32.xlu0 %v225_v23 }
  0x31   : > { %248 = vadd.xlane.f32.xlu1 %v247_v26 }
  0x32   : > { %245 = vadd.xlane.f32.xlu0 %v244_v27 }
  0x35   : > { %254 = vadd.xlane.f32.xlu1 %v253_v30 }
  0x36   : > { %251 = vadd.xlane.f32.xlu0 %v250_v31 }
  0x39   : > { %273 = vadd.xlane.f32.xlu1 %v272_v34 }
  0x3a   : > { %270 = vadd.xlane.f32.xlu0 %v269_v35 }
  0x3d   : > { %279 = vadd.xlane.f32.xlu1 %v278_v38 }
  0x3e   : > { %276 = vadd.xlane.f32.xlu0 %v275_v39 }
  0x41   : > { %298 = vadd.xlane.f32.xlu1 %v297_v42 }
  0x42   : > { %295 = vadd.xlane.f32.xlu0 %v294_v43 }
  0x45   : > { %304 = vadd.xlane.f32.xlu1 %v303_v46 }
  0x46   : > { %301 = vadd.xlane.f32.xlu0 %v300_v47 }
  0x49   : > { %323 = vadd.xlane.f32.xlu1 %v322_v50 }
  0x4a   : > { %320 = vadd.xlane.f32.xlu0 %v319_v51 }
  0x4d   : > { %329 = vadd.xlane.f32.xlu1 %v328_v54 }
  0x4e   : > { %326 = vadd.xlane.f32.xlu0 %v325_v55 }
  0x51   : > { %348 = vadd.xlane.f32.xlu1 %v347_v58 }
  0x52   : > { %345 = vadd.xlane.f32.xlu0 %v344_v59 }
  0x55   : > { %354 = vadd.xlane.f32.xlu1 %v353_v62 }
  0x56   : > { %351 = vadd.xlane.f32.xlu0 %v350_v63 }
  0xa2   : > { %v196_v5 = vpop.xlane.xlu1 %195 }
  0xa3   : > { %v175_v6 = vpop.xlane.xlu0 %174  ;;  %v206_v25 = vmul.f32 0.0625, %v196_v5 }
  0xa4   : > { %v185_v26 = vmul.f32 0.0625, %v175_v6 }
  0xa6   : > { %v199_v7 = vpop.xlane.xlu1 %198  ;;  %v210_v34 = vmax.f32 %v185_v26, %v206_v25 }
  0xa7   : > { %v178_v8 = vpop.xlane.xlu0 %177  ;;  %v207_v27 = vmul.f32 0.0625, %v199_v7  ;;  %v376_v7 = vshrl.u32 %v373_v33, 7 }
  0xa8   : > { %v186_v28 = vmul.f32 0.0625, %v178_v8  ;;  %v379_v8 = vadd.s32 4294967288, %v374_v52 }
  0xaa   : > { %v202_v9 = vpop.xlane.xlu1 %201  ;;  %v211_v35 = vmax.f32 %v186_v28, %v207_v27  ;;  %v382_v27 = vsub.s32 %v379_v8, %v376_v7  ;;  %v377_v28 = vsub.s32 %v374_v52, %v376_v7 }
  0xab   : > { %v181_v10 = vpop.xlane.xlu0 %180  ;;  %v208_v36 = vmul.f32 0.0625, %v202_v9 }
  0xac   : > { %v187_v37 = vmul.f32 0.0625, %v181_v10 }
  0xae   : > { %v205_v11 = vpop.xlane.xlu1 %204  ;;  %v212_v53 = vmax.f32 %v187_v37, %v208_v36 }
  0xaf   : > { %v184_v12 = vpop.xlane.xlu0 %183  ;;  %v209_v40 = vmul.f32 0.0625, %v205_v11 }
  0xb0   : > { %v188_v41 = vmul.f32 0.0625, %v184_v12 }
  0xb2   : > { %v224_v13 = vpop.xlane.xlu1 %223  ;;  %v213_v54 = vmax.f32 %v188_v41, %v209_v40 }
  0xb3   : > { %v221_v14 = vpop.xlane.xlu0 %220  ;;  %v232_v31 = vmul.f32 0.0625, %v224_v13 }
  0xb4   : > { %v231_v32 = vmul.f32 0.0625, %v221_v14 }
  0xb5   : > { %v236_v44 = vmax.f32 %v211_v35, %v232_v31 }
  0xb6   : > { %v230_v15 = vpop.xlane.xlu1 %229  ;;  %v235_v45 = vmax.f32 %v210_v34, %v231_v32 }
  0xb7   : > { %v227_v16 = vpop.xlane.xlu0 %226  ;;  %v234_v46 = vmul.f32 0.0625, %v230_v15  ;;  %v393_v15 = vadd.s32 4294967272, %v374_v52 }
  0xb8   : > { %v233_v47 = vmul.f32 0.0625, %v227_v16  ;;  %v386_v16 = vadd.s32 4294967280, %v374_v52 }
  0xb9   : > { %v238_v61 = vmax.f32 %v213_v54, %v234_v46  ;;  %v396_v33 = vsub.s32 %v393_v15, %v376_v7 }
  0xba   : > { %v249_v17 = vpop.xlane.xlu1 %248  ;;  %v237_v62 = vmax.f32 %v212_v53, %v233_v47  ;;  %v389_v35 = vsub.s32 %v386_v16, %v376_v7 }
  0xbb   : > { %v246_v18 = vpop.xlane.xlu0 %245  ;;  %v257_v42 = vmul.f32 0.0625, %v249_v17 }
  0xbc   : > { %v256_v43 = vmul.f32 0.0625, %v246_v18 }
  0xbd   : > { %v261_v55 = vmax.f32 %v236_v44, %v257_v42 }
  0xbe   : > { %v255_v19 = vpop.xlane.xlu1 %254  ;;  %v260_v56 = vmax.f32 %v235_v45, %v256_v43 }
  0xbf   : > { %v252_v20 = vpop.xlane.xlu0 %251  ;;  %v259_v57 = vmul.f32 0.0625, %v255_v19 }
  0xc0   : > { %v258_v58 = vmul.f32 0.0625, %v252_v20 }
  0xc1   : > { %v263_v9 = vmax.f32 %v238_v61, %v259_v57 }
  0xc2   : > { %v274_v21 = vpop.xlane.xlu1 %273  ;;  %v262_v10 = vmax.f32 %v237_v62, %v258_v58 }
  0xc3   : > { %v271_v22 = vpop.xlane.xlu0 %270  ;;  %v282_v48 = vmul.f32 0.0625, %v274_v21 }
  0xc4   : > { %v281_v49 = vmul.f32 0.0625, %v271_v22 }
  0xc5   : > { %v286_v63 = vmax.f32 %v261_v55, %v282_v48 }
  0xc6   : > { %v280_v23 = vpop.xlane.xlu1 %279  ;;  %v285_v0 = vmax.f32 %v260_v56, %v281_v49 }
  0xc7   : > { %v277_v24 = vpop.xlane.xlu0 %276  ;;  %v284_v1 = vmul.f32 0.0625, %v280_v23 }
  0xc8   : > { %v283_v2 = vmul.f32 0.0625, %v277_v24 }
  0xc9   : > { %v288_v17 = vmax.f32 %v263_v9, %v284_v1 }
  0xca   : > { %v299_v29 = vpop.xlane.xlu1 %298  ;;  %v287_v18 = vmax.f32 %v262_v10, %v283_v2 }
  0xcb   : > { %v296_v30 = vpop.xlane.xlu0 %295  ;;  %v307_v59 = vmul.f32 0.0625, %v299_v29 }
  0xcc   : > { %v306_v60 = vmul.f32 0.0625, %v296_v30 }
  0xcd   : > { %v311_v11 = vmax.f32 %v286_v63, %v307_v59 }
  0xce   : > { %v305_v38 = vpop.xlane.xlu1 %304  ;;  %v310_v12 = vmax.f32 %v285_v0, %v306_v60 }
  0xcf   : > { %v302_v39 = vpop.xlane.xlu0 %301  ;;  %v309_v13 = vmul.f32 0.0625, %v305_v38 }
  0xd0   : > { %v308_v14 = vmul.f32 0.0625, %v302_v39 }
  0xd1   : > { %v313_v29 = vmax.f32 %v288_v17, %v309_v13 }
  0xd2   : > { %v324_v50 = vpop.xlane.xlu1 %323  ;;  %v312_v30 = vmax.f32 %v287_v18, %v308_v14 }
  0xd3   : > { %v321_v51 = vpop.xlane.xlu0 %320  ;;  %v332_v3 = vmul.f32 0.0625, %v324_v50  ;;  %v368_v50 = vld [vmem:[%s899_s2] sm:$0x1] }
  0xd4   : > { %v331_v4 = vmul.f32 0.0625, %v321_v51 }
  0xd5   : > { %v336_v19 = vmax.f32 %v311_v11, %v332_v3 }
  0xd6   : > { %v330_v5 = vpop.xlane.xlu1 %329  ;;  %v335_v20 = vmax.f32 %v310_v12, %v331_v4 }
  0xd7   : > { %v327_v6 = vpop.xlane.xlu0 %326  ;;  %v334_v23 = vmul.f32 0.0625, %v330_v5 }
  0xd8   : > { %v333_v24 = vmul.f32 0.0625, %v327_v6 }
  0xd9   : > { %v338_v37 = vmax.f32 %v313_v29, %v334_v23 }
  0xda   : > { %v349_v21 = vpop.xlane.xlu1 %348  ;;  %v337_v38 = vmax.f32 %v312_v30, %v333_v24 }
  0xdb   : > { %v346_v22 = vpop.xlane.xlu0 %345  ;;  %v357_v25 = vmul.f32 0.0625, %v349_v21 }
  0xdc   : > { %v356_v26 = vmul.f32 0.0625, %v346_v22 }
  0xdd   : > { %v361_v31 = vmax.f32 %v336_v19, %v357_v25 }
  0xde   : > { %v360_v32 = vmax.f32 %v335_v20, %v356_v26  ;;  %v355_v34 = vpop.xlane.xlu1 %354 }
  0xdf   : > { %v352_v36 = vpop.xlane.xlu0 %351  ;;  %v359_v39 = vmul.f32 0.0625, %v355_v34  ;;  %v383_v41 = vrot.slane %v361_v31, %v382_v27 }
  0xe0   : > { %v358_v40 = vmul.f32 0.0625, %v352_v36  ;;  %v378_v42 = vrot.slane %v360_v32, %v377_v28 }
  0xe1   : > { %v363_v43 = vmax.f32 %v338_v37, %v359_v39 }
  0xe2   : > { %v362_v44 = vmax.f32 %v337_v38, %v358_v40  ;;  %v385_v47 = vsel %vm384_vm2, %v383_v41, %v378_v42 }
  0xe3   : > { %v397_v45 = vrot.slane %v363_v43, %v396_v33 }
  0xe4   : > { %v390_v46 = vrot.slane %v362_v44, %v389_v35 }
  0xe6   : > { %v392_v48 = vsel %vm391_vm3, %v390_v46, %v385_v47 }
  0xe7   : > { %v399_v49 = vsel %vm398_vm4, %v397_v45, %v392_v48 }
  0xe8   : > { %595 = vmatmul.mubr.msk.f32.vlgmr.msra.gmra.mxu0 %vm400_vm5, %v399_v49 }
 0x1a8   : > { %v469_v51 = vpop.f32.mrf.mxu0 }
 0x1a9   : > { %v470_v52 = vadd.f32 %v469_v51, %v368_v50 }
 0x1aa   : > { %v596_v53 = vpop.f32.mrf.mxu0 }
 0x1ab   : > { %473 = vst [vmem:[%s162_s20] sm:$0x1] %v470_v52 }
 0x1ac   : > { %651 = shalt.err (!%p648_p3)
}
 0x1ad   : > { %s652_s5 = scalar_lea.hbm %s862_s27, 16  ;;  %s656_s8 = scalar_lea.hbm %s900_s3, 32 }
 0x1ae   : > { %p653_p4 = scmp.ne.s32.totalorder %s862_s27, %s652_s5  ;;  %p657_p9 = scmp.lt.s32.totalorder %s862_s27, %s900_s3 }
 0x1af   : > { %p658_p10 = scmp.lt.s32.totalorder %s656_s8, %s652_s5 }
 0x1b0   : > { %p654_p7 = pnand %p653_p4, %p761_p5 }
 0x1b1   : > { %p659_p11 = por %p658_p10, %p657_p9 }
 0x1b2   : > { %p655_p8 = pneg %p654_p7 }
 0x1b4   : > { %p660_p12 = pnand %p659_p11, %p655_p8 }
 0x1b6   : > { %663 = shalt.err (!%p660_p12)
}
 0x1b7   : > { %597 = dma.vmem_to_hbm [thread:$0]  (%p761_p5), %s488_s24, 16, %s862_s27, %s475_s28  }
 0x1b8 PF: > { %p603_p13 = scmp.ge.s32.totalorder %s698_s15, 2  ;;  %s499_s11 = sand.u32 1, %s686_s12  }
 0x1b9   : > { %s500_s17 = scalar_lea.sflag [#allocation3], %s499_s11 }
 0x1ba   : > { %p600_p0 = pnand %p603_p13, %p765_p6 }
 0x1bc   : > { %p601_p1 = pneg %p600_p0 }
 0x1be   : > { %681 = dma.done.wait (%p601_p1), %s500_s17, 16  }
 0x1bf   : > { %683 = vsyncadd (%p601_p1), %s500_s17, 4294967280  ;;  %p13_p2 = scmp.ge.s32.totalorder %s748_s18, 4   ;;  %s903_s12 = smov %s690_s13 }
 0x1c0   : > { %s904_s13 = smov %s694_s14  ;;  %s905_s14 = smov %s759_s21 }
 0x1c1   : > { %s906_s15 = smov %s748_s18  ;;  %15 = sbr.rel (!%p13_p2) target bundleno = 3 (0x3), region = 74 }
 0x1c6   :  { %504 = vsyncpa [#allocation3], 1 }
 0x1c7   :  { %506 = vsyncpa [#allocation3 + $0x1], 1 }

// kernel: tpu_custom_call.1
= control target key start
LH: loop header
LB: loop body
LE: loop exit
PB: predicated region body
PF: predicated region fallthrough
CT: control target
= control target key end

     0   :  { %8 = vsyncpa [#allocation3], 0  ;;  %s897_s0 = inlined_call_operand.vmem [shape: f32[2,8,32,16], index: 0, kind: input, shape index: {}]   ;;  %s898_s1 = inlined_call_operand.vmem [shape: f32[32,128], index: 1, kind: input, shape index: {}]   ;;  %s899_s2 = inlined_call_operand.vmem [shape: f32[1,128], index: 2, kind: input, shape index: {}]   ;;  %s900_s3 = inlined_call_operand.hbm [shape: f32[2,1,128], index: 3, kind: output, shape index: {}]  }
   0x1   :  { %10 = vsyncpa [#allocation3 + $0x1], 0  ;;  %s723_s12 = smov 0   ;;  %s725_s13 = smov 0  }
   0x2   :  { %s727_s14 = smov 0   ;;  %s729_s15 = smov 0  }
   0x3 LB: > { %s744_s16 = sadd.s32 4294967295, %s698_s15   ;;  %s542_s17 = sadd.s32 4294967294, %s698_s15   ;;  %s698_s15 = sphi %s729_s15, %s906_s15   ;;  %s694_s14 = sphi %s727_s14, %s905_s14   ;;  %s690_s13 = sphi %s725_s13, %s904_s13   ;;  %s686_s12 = sphi %s723_s12, %s903_s12  }
   0x4   : > { %s748_s18 = sadd.s32 1, %s698_s15   ;;  %s91_s19 = sadd.s32 1, %s694_s14 }
   0x5   : > { %s88_s20 = ssub.s32 %s698_s15, %s748_s18  ;;  %p101_p0 = scmp.ne.s32.totalorder %s694_s14, %s690_s13 }
   0x6   : > { %p89_p1 = scmp.eq.s32.totalorder %s88_s20, 0  ;;  %p102_p2 = scmp.eq.s32.totalorder %s744_s16, 1 }
   0x7   : > { %p107_p3 = scmp.ne.s32.totalorder %s690_s13, %s686_s12  ;;  %p108_p4 = scmp.eq.s32.totalorder %s542_s17, 1 }
   0x8   : > { %s759_s21 = scalar_select %p89_p1, %s694_s14, %s91_s19  }
   0x9   : > { %p761_p5 = por %p102_p2, %p101_p0  ;;  %p765_p6 = por %p108_p4, %p107_p3 }
   0xa   : > { %p545_p7 = scmp.ge.s32.totalorder %s698_s15, 1  ;;  %p140_p8 = scmp.lt.s32.totalorder %s698_s15, 3 }
   0xc   : > { %p141_p9 = pnand %p545_p7, %p140_p8 }
   0xd   : > { %p163_p10 = scmp.lt.s32.totalorder (!%p141_p9), %s744_s16, 1  ;;  %s161_s10 = sand.u32 (!%p141_p9), 1, %s690_s13  }
   0xe   : > { %144 = sbr.rel (%p141_p9) target bundleno = 440 (0x1b8), region = 32  ;;  %s577_s19 = sshll.u32 (!%p141_p9), %s744_s16, 4 }
   0xf   : > { %s162_s20 = scalar_lea.vmem (!%p141_p9), [#allocation2], %s161_s10  ;;  %s862_s27 = scalar_lea.hbm (!%p141_p9), %s900_s3, %s577_s19 }
  0x10   : > { %s702_s30 = smov (!%p141_p9), [#allocation2]  }
  0x13   : > { %s164_s24 = scalar_select %p163_p10, %s744_s16, 1  ;;  %vm172_vm0 = vcmask 130048   ;;  %vm701_vm1 = vmmov 0   ;;  %vm384_vm2 = vcmask 130112   ;;  %vm391_vm3 = vcmask 195712  }
  0x14   : > { %vm398_vm4 = vcmask 261312   ;;  %vm400_vm5 = vcmask 261120   ;;  %s642_s16 = sshll.u32 %s702_s30, 4  ;;  %s643_s16 = int_to_ptr.vmem [resolvable:$false] %s642_s16 }
  0x15   : > { %s580_s25 = sshll.u32 %s164_s24, 8  ;;  %s487_s24 = sshll.u32 %s162_s20, 4  ;;  %s488_s24 = int_to_ptr.vmem [resolvable:$true] %s487_s24 }
  0x16   : > { %s776_s28 = scalar_lea.vmem %s897_s0, %s580_s25  ;;  %s638_s29 = scalar_lea.vmem %s488_s24, 16 }
  0x17   : > { %v548_v0 = vld [vmem:[%s776_s28 + $0x20] sm:$0xff]  ;;  %v549_v2 = vld [vmem:[%s776_s28 + $0x28] sm:$0xff]  ;;  %v550_v8 = vld [vmem:[%s776_s28 + $0x30] sm:$0xff]  ;;  %p639_p11 = scmp.ne.s32.totalorder %s488_s24, %s638_s29  ;;  %s644_s4 = scalar_lea.vmem %s643_s16, 32 }
  0x18   : > { %v168_v1 = vld [vmem:[%s776_s28] sm:$0xff]  ;;  %v194_v3 = vsel %vm172_vm0, %v548_v0, 0.0  ;;  %v169_v5 = vld [vmem:[%s776_s28 + $0x8] sm:$0xff]  ;;  %v197_v6 = vsel %vm172_vm0, %v549_v2, 0.0  ;;  %v170_v9 = vld [vmem:[%s776_s28 + $0x10] sm:$0xff]  ;;  %v200_v10 = vsel %vm172_vm0, %v550_v8, 0.0  ;;  %p645_p0 = scmp.lt.s32.totalorder %s488_s24, %s643_s16  ;;  %p646_p1 = scmp.lt.s32.totalorder %s644_s4, %s638_s29 }
  0x19   : > { %v173_v4 = vsel %vm172_vm0, %v168_v1, 0.0  ;;  %195 = vadd.xlane.f32.xlu1 %v194_v3  ;;  %v176_v7 = vsel %vm172_vm0, %v169_v5, 0.0  ;;  %v179_v11 = vsel %vm172_vm0, %v170_v9, 0.0  ;;  %v551_v12 = vld [vmem:[%s776_s28 + $0x38] sm:$0xff]  ;;  %v553_v16 = vld [vmem:[%s776_s28 + $0x48] sm:$0xff]  ;;  %v552_v17 = vld [vmem:[%s776_s28 + $0x40] sm:$0xff]  ;;  %p640_p12 = pnand %p639_p11, %p761_p5 }
  0x1a   : > { %174 = vadd.xlane.f32.xlu0 %v173_v4  ;;  %v171_v13 = vld [vmem:[%s776_s28 + $0x18] sm:$0xff]  ;;  %v203_v14 = vsel %vm172_vm0, %v551_v12, 0.0  ;;  %v222_v18 = vsel %vm172_vm0, %v553_v16, 0.0  ;;  %v219_v19 = vsel %vm172_vm0, %v552_v17, 0.0  ;;  %v554_v21 = vld [vmem:[%s776_s28 + $0x50] sm:$0xff]  ;;  %v557_v24 = vld [vmem:[%s776_s28 + $0x68] sm:$0xff]  ;;  %p647_p2 = por %p646_p1, %p645_p0 }
  0x1b   : > { %v182_v15 = vsel %vm172_vm0, %v171_v13, 0.0  ;;  %v555_v20 = vld [vmem:[%s776_s28 + $0x58] sm:$0xff]  ;;  %v225_v23 = vsel %vm172_vm0, %v554_v21, 0.0  ;;  %v556_v25 = vld [vmem:[%s776_s28 + $0x60] sm:$0xff]  ;;  %v247_v26 = vsel %vm172_vm0, %v557_v24, 0.0  ;;  %v558_v29 = vld [vmem:[%s776_s28 + $0x70] sm:$0xff]  ;;  %p641_p13 = pneg %p640_p12 }
  0x1c   : > { %v228_v22 = vsel %vm172_vm0, %v555_v20, 0.0  ;;  %v244_v27 = vsel %vm172_vm0, %v556_v25, 0.0  ;;  %v559_v28 = vld [vmem:[%s776_s28 + $0x78] sm:$0xff]  ;;  %v250_v31 = vsel %vm172_vm0, %v558_v29, 0.0  ;;  %v561_v32 = vld [vmem:[%s776_s28 + $0x88] sm:$0xff]  ;;  %v560_v33 = vld [vmem:[%s776_s28 + $0x80] sm:$0xff] }
  0x1d   : > { %198 = vadd.xlane.f32.xlu1 %v197_v6  ;;  %v253_v30 = vsel %vm172_vm0, %v559_v28, 0.0  ;;  %v272_v34 = vsel %vm172_vm0, %v561_v32, 0.0  ;;  %v269_v35 = vsel %vm172_vm0, %v560_v33, 0.0  ;;  %v563_v36 = vld [vmem:[%s776_s28 + $0x98] sm:$0xff]  ;;  %v562_v37 = vld [vmem:[%s776_s28 + $0x90] sm:$0xff]  ;;  %v565_v40 = vld [vmem:[%s776_s28 + $0xa8] sm:$0xff]  ;;  %v373_v33 = vlaneseq  ;;  %p648_p3 = pnand %p647_p2, %p641_p13 }
  0x1e   : > { %177 = vadd.xlane.f32.xlu0 %v176_v7  ;;  %v278_v38 = vsel %vm172_vm0, %v563_v36, 0.0  ;;  %v275_v39 = vsel %vm172_vm0, %v562_v37, 0.0  ;;  %v564_v41 = vld [vmem:[%s776_s28 + $0xa0] sm:$0xff]  ;;  %v297_v42 = vsel %vm172_vm0, %v565_v40, 0.0  ;;  %v567_v44 = vld [vmem:[%s776_s28 + $0xb8] sm:$0xff]  ;;  %v566_v45 = vld [vmem:[%s776_s28 + $0xb0] sm:$0xff] }
  0x1f   : > { %v294_v43 = vsel %vm172_vm0, %v564_v41, 0.0  ;;  %v303_v46 = vsel %vm172_vm0, %v567_v44, 0.0  ;;  %v300_v47 = vsel %vm172_vm0, %v566_v45, 0.0  ;;  %v569_v48 = vld [vmem:[%s776_s28 + $0xc8] sm:$0xff]  ;;  %v568_v49 = vld [vmem:[%s776_s28 + $0xc0] sm:$0xff]  ;;  %v571_v52 = vld [vmem:[%s776_s28 + $0xd8] sm:$0xff] }
  0x20   : > { %v322_v50 = vsel %vm172_vm0, %v569_v48, 0.0  ;;  %v319_v51 = vsel %vm172_vm0, %v568_v49, 0.0  ;;  %v570_v53 = vld [vmem:[%s776_s28 + $0xd0] sm:$0xff]  ;;  %v328_v54 = vsel %vm172_vm0, %v571_v52, 0.0  ;;  %v573_v56 = vld [vmem:[%s776_s28 + $0xe8] sm:$0xff]  ;;  %v572_v57 = vld [vmem:[%s776_s28 + $0xe0] sm:$0xff] }
  0x21   : > { %201 = vadd.xlane.f32.xlu1 %v200_v10  ;;  %v325_v55 = vsel %vm172_vm0, %v570_v53, 0.0  ;;  %v347_v58 = vsel %vm172_vm0, %v573_v56, 0.0  ;;  %v344_v59 = vsel %vm172_vm0, %v572_v57, 0.0  ;;  %v575_v60 = vld [vmem:[%s776_s28 + $0xf8] sm:$0xff]  ;;  %v574_v61 = vld [vmem:[%s776_s28 + $0xf0] sm:$0xff]  ;;  %v700_v0 = vmov 0.0  }
  0x22   : > { %180 = vadd.xlane.f32.xlu0 %v179_v11  ;;  %v353_v62 = vsel %vm172_vm0, %v575_v60, 0.0  ;;  %v350_v63 = vsel %vm172_vm0, %v574_v61, 0.0  ;;  %586 = vmatprep.subr.mxu0 %v700_v0  ;;  %v367_v1 = vld [vmem:[%s898_s1 + $0x18] sm:$0xff]  ;;  %v366_v2 = vld [vmem:[%s898_s1 + $0x10] sm:$0xff]  ;;  %v365_v3 = vld [vmem:[%s898_s1 + $0x8] sm:$0xff]  ;;  %v374_v52 = vand.u32 127, %v373_v33 }
  0x23   : > { %587 = vmatpush3.msra.mxu0 %v367_v1  ;;  %v364_v4 = vld [vmem:[%s898_s1] sm:$0xff]  ;;  %594 = vmatprep.mubr.msk.f32.mxu0 %vm701_vm1, %v700_v0  ;;  %s475_s28 = scalar_lea.sflag [#allocation3], %s161_s10 }
  0x24   : > { %588 = vmatprep.subr.mxu0 %v700_v0 }
  0x25   : > { %204 = vadd.xlane.f32.xlu1 %v203_v14  ;;  %589 = vmatpush3.msra.mxu0 %v366_v2 }
  0x26   : > { %183 = vadd.xlane.f32.xlu0 %v182_v15  ;;  %590 = vmatprep.subr.mxu0 %v700_v0 }
  0x27   : > { %591 = vmatpush3.msra.mxu0 %v365_v3 }
  0x28   : > { %592 = vmatprep.subr.mxu0 %v700_v0 }
  0x29   : > { %223 = vadd.xlane.f32.xlu1 %v222_v18  ;;  %593 = vmatpush3.msra.mxu0 %v364_v4 }
  0x2a   : > { %220 = vadd.xlane.f32.xlu0 %v219_v19 }
  0x2d   : > { %229 = vadd.xlane.f32.xlu1 %v228_v22 }
  0x2e   : > { %226 = vadd.xlane.f32.xlu0 %v225_v23 }
  0x31   : > { %248 = vadd.xlane.f32.xlu1 %v247_v26 }
  0x32   : > { %245 = vadd.xlane.f32.xlu0 %v244_v27 }
  0x35   : > { %254 = vadd.xlane.f32.xlu1 %v253_v30 }
  0x36   : > { %251 = vadd.xlane.f32.xlu0 %v250_v31 }
  0x39   : > { %273 = vadd.xlane.f32.xlu1 %v272_v34 }
  0x3a   : > { %270 = vadd.xlane.f32.xlu0 %v269_v35 }
  0x3d   : > { %279 = vadd.xlane.f32.xlu1 %v278_v38 }
  0x3e   : > { %276 = vadd.xlane.f32.xlu0 %v275_v39 }
  0x41   : > { %298 = vadd.xlane.f32.xlu1 %v297_v42 }
  0x42   : > { %295 = vadd.xlane.f32.xlu0 %v294_v43 }
  0x45   : > { %304 = vadd.xlane.f32.xlu1 %v303_v46 }
  0x46   : > { %301 = vadd.xlane.f32.xlu0 %v300_v47 }
  0x49   : > { %323 = vadd.xlane.f32.xlu1 %v322_v50 }
  0x4a   : > { %320 = vadd.xlane.f32.xlu0 %v319_v51 }
  0x4d   : > { %329 = vadd.xlane.f32.xlu1 %v328_v54 }
  0x4e   : > { %326 = vadd.xlane.f32.xlu0 %v325_v55 }
  0x51   : > { %348 = vadd.xlane.f32.xlu1 %v347_v58 }
  0x52   : > { %345 = vadd.xlane.f32.xlu0 %v344_v59 }
  0x55   : > { %354 = vadd.xlane.f32.xlu1 %v353_v62 }
  0x56   : > { %351 = vadd.xlane.f32.xlu0 %v350_v63 }
  0xa2   : > { %v196_v5 = vpop.xlane.xlu1 %195 }
  0xa3   : > { %v175_v6 = vpop.xlane.xlu0 %174  ;;  %v206_v25 = vmul.f32 0.0625, %v196_v5 }
  0xa4   : > { %v185_v26 = vmul.f32 0.0625, %v175_v6 }
  0xa6   : > { %v199_v7 = vpop.xlane.xlu1 %198  ;;  %v210_v34 = vmax.f32 %v185_v26, %v206_v25 }
  0xa7   : > { %v178_v8 = vpop.xlane.xlu0 %177  ;;  %v207_v27 = vmul.f32 0.0625, %v199_v7  ;;  %v376_v7 = vshrl.u32 %v373_v33, 7 }
  0xa8   : > { %v186_v28 = vmul.f32 0.0625, %v178_v8  ;;  %v379_v8 = vadd.s32 4294967288, %v374_v52 }
  0xaa   : > { %v202_v9 = vpop.xlane.xlu1 %201  ;;  %v211_v35 = vmax.f32 %v186_v28, %v207_v27  ;;  %v382_v27 = vsub.s32 %v379_v8, %v376_v7  ;;  %v377_v28 = vsub.s32 %v374_v52, %v376_v7 }
  0xab   : > { %v181_v10 = vpop.xlane.xlu0 %180  ;;  %v208_v36 = vmul.f32 0.0625, %v202_v9 }
  0xac   : > { %v187_v37 = vmul.f32 0.0625, %v181_v10 }
  0xae   : > { %v205_v11 = vpop.xlane.xlu1 %204  ;;  %v212_v53 = vmax.f32 %v187_v37, %v208_v36 }
  0xaf   : > { %v184_v12 = vpop.xlane.xlu0 %183  ;;  %v209_v40 = vmul.f32 0.0625, %v205_v11 }
  0xb0   : > { %v188_v41 = vmul.f32 0.0625, %v184_v12 }
  0xb2   : > { %v224_v13 = vpop.xlane.xlu1 %223  ;;  %v213_v54 = vmax.f32 %v188_v41, %v209_v40 }
  0xb3   : > { %v221_v14 = vpop.xlane.xlu0 %220  ;;  %v232_v31 = vmul.f32 0.0625, %v224_v13 }
  0xb4   : > { %v231_v32 = vmul.f32 0.0625, %v221_v14 }
  0xb5   : > { %v236_v44 = vmax.f32 %v211_v35, %v232_v31 }
  0xb6   : > { %v230_v15 = vpop.xlane.xlu1 %229  ;;  %v235_v45 = vmax.f32 %v210_v34, %v231_v32 }
  0xb7   : > { %v227_v16 = vpop.xlane.xlu0 %226  ;;  %v234_v46 = vmul.f32 0.0625, %v230_v15  ;;  %v393_v15 = vadd.s32 4294967272, %v374_v52 }
  0xb8   : > { %v233_v47 = vmul.f32 0.0625, %v227_v16  ;;  %v386_v16 = vadd.s32 4294967280, %v374_v52 }
  0xb9   : > { %v238_v61 = vmax.f32 %v213_v54, %v234_v46  ;;  %v396_v33 = vsub.s32 %v393_v15, %v376_v7 }
  0xba   : > { %v249_v17 = vpop.xlane.xlu1 %248  ;;  %v237_v62 = vmax.f32 %v212_v53, %v233_v47  ;;  %v389_v35 = vsub.s32 %v386_v16, %v376_v7 }
  0xbb   : > { %v246_v18 = vpop.xlane.xlu0 %245  ;;  %v257_v42 = vmul.f32 0.0625, %v249_v17 }
  0xbc   : > { %v256_v43 = vmul.f32 0.0625, %v246_v18 }
  0xbd   : > { %v261_v55 = vmax.f32 %v236_v44, %v257_v42 }
  0xbe   : > { %v255_v19 = vpop.xlane.xlu1 %254  ;;  %v260_v56 = vmax.f32 %v235_v45, %v256_v43 }
  0xbf   : > { %v252_v20 = vpop.xlane.xlu0 %251  ;;  %v259_v57 = vmul.f32 0.0625, %v255_v19 }
  0xc0   : > { %v258_v58 = vmul.f32 0.0625, %v252_v20 }
  0xc1   : > { %v263_v9 = vmax.f32 %v238_v61, %v259_v57 }
  0xc2   : > { %v274_v21 = vpop.xlane.xlu1 %273  ;;  %v262_v10 = vmax.f32 %v237_v62, %v258_v58 }
  0xc3   : > { %v271_v22 = vpop.xlane.xlu0 %270  ;;  %v282_v48 = vmul.f32 0.0625, %v274_v21 }
  0xc4   : > { %v281_v49 = vmul.f32 0.0625, %v271_v22 }
  0xc5   : > { %v286_v63 = vmax.f32 %v261_v55, %v282_v48 }
  0xc6   : > { %v280_v23 = vpop.xlane.xlu1 %279  ;;  %v285_v0 = vmax.f32 %v260_v56, %v281_v49 }
  0xc7   : > { %v277_v24 = vpop.xlane.xlu0 %276  ;;  %v284_v1 = vmul.f32 0.0625, %v280_v23 }
  0xc8   : > { %v283_v2 = vmul.f32 0.0625, %v277_v24 }
  0xc9   : > { %v288_v17 = vmax.f32 %v263_v9, %v284_v1 }
  0xca   : > { %v299_v29 = vpop.xlane.xlu1 %298  ;;  %v287_v18 = vmax.f32 %v262_v10, %v283_v2 }
  0xcb   : > { %v296_v30 = vpop.xlane.xlu0 %295  ;;  %v307_v59 = vmul.f32 0.0625, %v299_v29 }
  0xcc   : > { %v306_v60 = vmul.f32 0.0625, %v296_v30 }
  0xcd   : > { %v311_v11 = vmax.f32 %v286_v63, %v307_v59 }
  0xce   : > { %v305_v38 = vpop.xlane.xlu1 %304  ;;  %v310_v12 = vmax.f32 %v285_v0, %v306_v60 }
  0xcf   : > { %v302_v39 = vpop.xlane.xlu0 %301  ;;  %v309_v13 = vmul.f32 0.0625, %v305_v38 }
  0xd0   : > { %v308_v14 = vmul.f32 0.0625, %v302_v39 }
  0xd1   : > { %v313_v29 = vmax.f32 %v288_v17, %v309_v13 }
  0xd2   : > { %v324_v50 = vpop.xlane.xlu1 %323  ;;  %v312_v30 = vmax.f32 %v287_v18, %v308_v14 }
  0xd3   : > { %v321_v51 = vpop.xlane.xlu0 %320  ;;  %v332_v3 = vmul.f32 0.0625, %v324_v50  ;;  %v368_v50 = vld [vmem:[%s899_s2] sm:$0x1] }
  0xd4   : > { %v331_v4 = vmul.f32 0.0625, %v321_v51 }
  0xd5   : > { %v336_v19 = vmax.f32 %v311_v11, %v332_v3 }
  0xd6   : > { %v330_v5 = vpop.xlane.xlu1 %329  ;;  %v335_v20 = vmax.f32 %v310_v12, %v331_v4 }
  0xd7   : > { %v327_v6 = vpop.xlane.xlu0 %326  ;;  %v334_v23 = vmul.f32 0.0625, %v330_v5 }
  0xd8   : > { %v333_v24 = vmul.f32 0.0625, %v327_v6 }
  0xd9   : > { %v338_v37 = vmax.f32 %v313_v29, %v334_v23 }
  0xda   : > { %v349_v21 = vpop.xlane.xlu1 %348  ;;  %v337_v38 = vmax.f32 %v312_v30, %v333_v24 }
  0xdb   : > { %v346_v22 = vpop.xlane.xlu0 %345  ;;  %v357_v25 = vmul.f32 0.0625, %v349_v21 }
  0xdc   : > { %v356_v26 = vmul.f32 0.0625, %v346_v22 }
  0xdd   : > { %v361_v31 = vmax.f32 %v336_v19, %v357_v25 }
  0xde   : > { %v360_v32 = vmax.f32 %v335_v20, %v356_v26  ;;  %v355_v34 = vpop.xlane.xlu1 %354 }
  0xdf   : > { %v352_v36 = vpop.xlane.xlu0 %351  ;;  %v359_v39 = vmul.f32 0.0625, %v355_v34  ;;  %v383_v41 = vrot.slane %v361_v31, %v382_v27 }
  0xe0   : > { %v358_v40 = vmul.f32 0.0625, %v352_v36  ;;  %v378_v42 = vrot.slane %v360_v32, %v377_v28 }
  0xe1   : > { %v363_v43 = vmax.f32 %v338_v37, %v359_v39 }
  0xe2   : > { %v362_v44 = vmax.f32 %v337_v38, %v358_v40  ;;  %v385_v47 = vsel %vm384_vm2, %v383_v41, %v378_v42 }
  0xe3   : > { %v397_v45 = vrot.slane %v363_v43, %v396_v33 }
  0xe4   : > { %v390_v46 = vrot.slane %v362_v44, %v389_v35 }
  0xe6   : > { %v392_v48 = vsel %vm391_vm3, %v390_v46, %v385_v47 }
  0xe7   : > { %v399_v49 = vsel %vm398_vm4, %v397_v45, %v392_v48 }
  0xe8   : > { %595 = vmatmul.mubr.msk.f32.vlgmr.msra.gmra.mxu0 %vm400_vm5, %v399_v49 }
 0x1a8   : > { %v469_v51 = vpop.f32.mrf.mxu0 }
 0x1a9   : > { %v470_v52 = vadd.f32 %v469_v51, %v368_v50 }
 0x1aa   : > { %v596_v53 = vpop.f32.mrf.mxu0 }
 0x1ab   : > { %473 = vst [vmem:[%s162_s20] sm:$0x1] %v470_v52 }
 0x1ac   : > { %651 = shalt.err (!%p648_p3)
}
 0x1ad   : > { %s652_s5 = scalar_lea.hbm %s862_s27, 16  ;;  %s656_s8 = scalar_lea.hbm %s900_s3, 32 }
 0x1ae   : > { %p653_p4 = scmp.ne.s32.totalorder %s862_s27, %s652_s5  ;;  %p657_p9 = scmp.lt.s32.totalorder %s862_s27, %s900_s3 }
 0x1af   : > { %p658_p10 = scmp.lt.s32.totalorder %s656_s8, %s652_s5 }
 0x1b0   : > { %p654_p7 = pnand %p653_p4, %p761_p5 }
 0x1b1   : > { %p659_p11 = por %p658_p10, %p657_p9 }
 0x1b2   : > { %p655_p8 = pneg %p654_p7 }
 0x1b4   : > { %p660_p12 = pnand %p659_p11, %p655_p8 }
 0x1b6   : > { %663 = shalt.err (!%p660_p12)
}
 0x1b7   : > { %597 = dma.vmem_to_hbm [thread:$0]  (%p761_p5), %s488_s24, 16, %s862_s27, %s475_s28  }
 0x1b8 PF: > { %p603_p13 = scmp.ge.s32.totalorder %s698_s15, 2  ;;  %s499_s11 = sand.u32 1, %s686_s12  }
 0x1b9   : > { %s500_s17 = scalar_lea.sflag [#allocation3], %s499_s11 }
 0x1ba   : > { %p600_p0 = pnand %p603_p13, %p765_p6 }
 0x1bc   : > { %p601_p1 = pneg %p600_p0 }
 0x1be   : > { %681 = dma.done.wait (%p601_p1), %s500_s17, 16  }
 0x1bf   : > { %683 = vsyncadd (%p601_p1), %s500_s17, 4294967280  ;;  %p13_p2 = scmp.ge.s32.totalorder %s748_s18, 4   ;;  %s903_s12 = smov %s690_s13 }
 0x1c0   : > { %s904_s13 = smov %s694_s14  ;;  %s905_s14 = smov %s759_s21 }
 0x1c1   : > { %s906_s15 = smov %s748_s18  ;;  %15 = sbr.rel (!%p13_p2) target bundleno = 3 (0x3), region = 74 }
 0x1c6   :  { %504 = vsyncpa [#allocation3], 1 }
 0x1c7   :  { %506 = vsyncpa [#allocation3 + $0x1], 1 }

</bundles_post_ra>
